<compile_context>
chip_gen: v5e
topology: v5e:2x2
jax: 0.10.0
libtpu: 0.0.40
codegen_flags: <defaults>
</compile_context>

<pallas_src>
import functools

import jax
import jax.numpy as jnp
from jax import lax
from jax.experimental import pallas as pl
from jax.experimental.pallas import tpu as pltpu

# ---------------- model dims (small, consistent with the module) ----------------
S = 8            # sequence length
B = 2            # batch
E = 32           # d_model
H = 4            # nhead
DH = E // H      # head dim
F = 64           # dim_feedforward
BS = B * S
EPS = 1e-5

assert F == 2 * E, "parameter packing below assumes dim_feedforward == 2 * d_model"


# ---------------------------------- kernel --------------------------------------
def _encoder_layer_kernel(x_ref, pos_ref, wa_ref, wb_ref, va_ref, vb_ref,
                          out_ref, attn_scr):
    x = x_ref[...]                      # (BS, E)
    xqk = x + pos_ref[...]              # q = k = src + pos

    # ---- unpack bundled parameters (all static slices) ----
    w_qk = wa_ref[0]                    # (E, 2E)  = [wq * scale | wk]
    w1 = wa_ref[1]                      # (E, F)
    w_vo = wb_ref[0]                    # (2E, E)  = [wv ; wo]
    w2 = wb_ref[1]                      # (F, E)
    wv = w_vo[:E, :]
    wo = w_vo[E:, :]

    va = va_ref[...]                    # (2, 2E)
    b_qk = va[0:1, :]                   # [bq * scale | bk]
    b1 = va[1:2, :]
    vec_e = vb_ref[...]                 # (8, E)
    bv, bo, b2 = vec_e[0:1, :], vec_e[1:2, :], vec_e[2:3, :]
    g1, be1 = vec_e[3:4, :], vec_e[4:5, :]
    g2, be2 = vec_e[5:6, :], vec_e[6:7, :]

    # ---- fused Q/K projection + V projection over all batches at once ----
    qk = jnp.dot(xqk, w_qk, preferred_element_type=jnp.float32) + b_qk    # (BS, 2E)
    q = qk[:, :E]                       # already scaled by 1/sqrt(DH) (folded into w_qk)
    k = qk[:, E:]
    v = jnp.dot(x, wv, preferred_element_type=jnp.float32) + bv           # (BS, E)

    # ---- per-batch, per-head attention (static loops); heads written into VMEM scratch ----
    for b in range(B):
        rs = slice(b * S, (b + 1) * S)
        qb, kb, vrows = q[rs, :], k[rs, :], v[rs, :]                       # (S, E)
        for h in range(H):
            cs = slice(h * DH, (h + 1) * DH)
            qh, kh, vh = qb[:, cs], kb[:, cs], vrows[:, cs]                # (S, DH)
            # scores = qh @ kh^T without an explicit transpose (contract last dims)
            s = lax.dot_general(qh, kh, (((1,), (1,)), ((), ())),
                                preferred_element_type=jnp.float32)        # (S, S)
            s = s - jnp.max(s, axis=-1, keepdims=True)
            e = jnp.exp(s)
            a = e * pl.reciprocal(jnp.sum(e, axis=-1, keepdims=True), approx=True)
            attn_scr[rs, cs] = jnp.dot(a, vh, preferred_element_type=jnp.float32)

    # ---- output projection over all batches ----
    attn = jnp.dot(attn_scr[...], wo, preferred_element_type=jnp.float32) + bo   # (BS, E)

    # ---- residual + LayerNorm1 (dropout1 = identity) ----
    y = x + attn
    mu = jnp.mean(y, axis=-1, keepdims=True)
    var = jnp.mean((y - mu) * (y - mu), axis=-1, keepdims=True)
    y = (y - mu) * lax.rsqrt(var + EPS) * g1 + be1

    # ---- feed-forward: linear2(relu(linear1(y))) (dropout = identity) ----
    h1 = jnp.maximum(jnp.dot(y, w1, preferred_element_type=jnp.float32) + b1, 0.0)  # (BS, F)
    f = jnp.dot(h1, w2, preferred_element_type=jnp.float32) + b2                    # (BS, E)

    # ---- residual + LayerNorm2 (dropout2 = identity) ----
    z = y + f
    mu2 = jnp.mean(z, axis=-1, keepdims=True)
    var2 = jnp.mean((z - mu2) * (z - mu2), axis=-1, keepdims=True)
    out_ref[...] = (z - mu2) * lax.rsqrt(var2 + EPS) * g2 + be2


# --------------------------- parameter packing (one-time) ------------------------
def pack_params(p):
    """Bundle the 16 per-layer tensors into 4 stacked arrays (4 DMAs instead of 16)."""
    scale = DH ** -0.5
    w_qk = jnp.concatenate([p["wq"] * scale, p["wk"]], axis=1)          # (E, 2E)
    w_a = jnp.stack([w_qk, p["w1"]], axis=0)                            # (2, E, 2E)
    w_vo = jnp.concatenate([p["wv"], p["wo"]], axis=0)                  # (2E, E)
    w_b = jnp.stack([w_vo, p["w2"]], axis=0)                            # (2, 2E, E)
    b_qk = jnp.concatenate([p["bq"] * scale, p["bk"]], axis=1)          # (1, 2E)
    v_a = jnp.concatenate([b_qk, p["b1"]], axis=0)                      # (2, 2E)
    v_b = jnp.concatenate([p["bv"], p["bo"], p["b2"], p["g1"], p["be1"],
                           p["g2"], p["be2"],
                           jnp.zeros((1, E), jnp.float32)], axis=0)     # (8, E)
    return w_a, w_b, v_a, v_b


# --------------------------------- wrapper --------------------------------------
@jax.jit
def transformer_encoder_layer(src_bse, pos_bse, w_a, w_b, v_a, v_b):
    """src_bse, pos_bse: (B, S, E) -- module-external layout (no transposes needed)."""
    x = src_bse.reshape(BS, E)     # contiguous reshape: free bitcast, no copy
    p = pos_bse.reshape(BS, E)

    def full(shape):
        return pl.BlockSpec(shape, lambda i, _n=len(shape): (0,) * _n)

    out = pl.pallas_call(
        _encoder_layer_kernel,
        out_shape=jax.ShapeDtypeStruct((BS, E), jnp.float32),
        grid_spec=pltpu.PrefetchScalarGridSpec(
            num_scalar_prefetch=0,
            grid=(1,),                                  # single fused step
            in_specs=[full((BS, E)), full((BS, E)),
                      full((2, E, 2 * E)), full((2, 2 * E, E)),
                      full((2, 2 * E)), full((8, E))],
            out_specs=full((BS, E)),
            scratch_shapes=[pltpu.VMEM((BS, E), jnp.float32)],   # per-head attn assembly
        ),
        compiler_params=pltpu.CompilerParams(dimension_semantics=("arbitrary",)),
    )(x, p, w_a, w_b, v_a, v_b)

    return out.reshape(B, S, E)


# ---------------------------- pure-JAX reference ---------------------------------
def reference(src, pos, p):
    """src, pos: (B, S, E).  Mirrors TransformerEncoderLayer.forward_post in eval mode."""
    x = src
    xqk = x + pos
    q = xqk @ p["wq"] + p["bq"]
    k = xqk @ p["wk"] + p["bk"]
    v = x @ p["wv"] + p["bv"]
    scale = DH ** -0.5
    qh = q.reshape(B, S, H, DH).transpose(0, 2, 1, 3) * scale
    kh = k.reshape(B, S, H, DH).transpose(0, 2, 1, 3)
    vh = v.reshape(B, S, H, DH).transpose(0, 2, 1, 3)
    s = jnp.einsum("bhqd,bhkd->bhqk", qh, kh)
    a = jax.nn.softmax(s, axis=-1)
    o = jnp.einsum("bhqk,bhkd->bhqd", a, vh).transpose(0, 2, 1, 3).reshape(B, S, E)
    attn = o @ p["wo"] + p["bo"]

    def ln(t, g, b):
        mu = jnp.mean(t, axis=-1, keepdims=True)
        var = jnp.mean((t - mu) ** 2, axis=-1, keepdims=True)
        return (t - mu) * lax.rsqrt(var + EPS) * g + b

    y = ln(x + attn, p["g1"], p["be1"])
    f = jnp.maximum(y @ p["w1"] + p["b1"], 0.0) @ p["w2"] + p["b2"]
    return ln(y + f, p["g2"], p["be2"])


# ----------------------------------- main ----------------------------------------
if __name__ == "__main__":
    key = jax.random.PRNGKey(0)
    keys = jax.random.split(key, 16)

    def init(k, shape, scale=0.1):
        return (scale * jax.random.normal(k, shape)).astype(jnp.float32)

    # Parameters (weights stored as (in, out), i.e. already transposed vs. PyTorch).
    params = {
        "wq": init(keys[0], (E, E)),  "bq": init(keys[1], (1, E)),
        "wk": init(keys[2], (E, E)),  "bk": init(keys[3], (1, E)),
        "wv": init(keys[4], (E, E)),  "bv": init(keys[5], (1, E)),
        "wo": init(keys[6], (E, E)),  "bo": init(keys[7], (1, E)),
        "w1": init(keys[8], (E, F)),  "b1": init(keys[9], (1, F)),
        "w2": init(keys[10], (F, E)), "b2": init(keys[11], (1, E)),
        "g1": jnp.ones((1, E), jnp.float32),  "be1": jnp.zeros((1, E), jnp.float32),
        "g2": jnp.ones((1, E), jnp.float32),  "be2": jnp.zeros((1, E), jnp.float32),
    }

    # (B, S, E) -- TransformerStepwise's external layout (before its internal permute).
    src = jax.random.normal(keys[12], (B, S, E), dtype=jnp.float32)
    pos = jax.random.normal(keys[13], (B, S, E), dtype=jnp.float32)

    packed = pack_params(params)

    out = transformer_encoder_layer(src, pos, *packed)
    out = jax.block_until_ready(out)

    ref = reference(src, pos, params)
    assert out.shape == (B, S, E)
    # Tolerance 1e-3: the softmax denominator uses the EUP approximate reciprocal
    # (pl.reciprocal(approx=True)); everything else is exact f32.
    assert jnp.allclose(out, ref, atol=1e-3, rtol=1e-3), "mismatch vs reference"

    print("KERNEL_OK")
</pallas_src>

<mosaic_0001>
module attributes {stable_mosaic.version = 11 : i64} {
  func.func @_encoder_layer_kernel(%arg0: i32, %arg1: memref<16x32xf32, #tpu.memory_space<vmem>>, %arg2: memref<16x32xf32, #tpu.memory_space<vmem>>, %arg3: memref<2x32x64xf32, #tpu.memory_space<vmem>>, %arg4: memref<2x64x32xf32, #tpu.memory_space<vmem>>, %arg5: memref<2x64xf32, #tpu.memory_space<vmem>>, %arg6: memref<8x32xf32, #tpu.memory_space<vmem>>, %arg7: memref<16x32xf32, #tpu.memory_space<vmem>>, %arg8: memref<16x32xf32, #tpu.memory_space<vmem>>) attributes {dimension_semantics = [#tpu.dimension_semantics<arbitrary>], iteration_bounds = array<i64: 1>, scalar_prefetch = 0 : i64, scratch_operands = 1 : i64, tpu.core_type = #tpu.core_type<tc>, window_params = [{pipeline_mode = #tpu.pipeline_mode<synchronous>, transform_indices = @transform_0, window_bounds = array<i64: 16, 32>}, {pipeline_mode = #tpu.pipeline_mode<synchronous>, transform_indices = @transform_1, window_bounds = array<i64: 16, 32>}, {pipeline_mode = #tpu.pipeline_mode<synchronous>, transform_indices = @transform_2, window_bounds = array<i64: 2, 32, 64>}, {pipeline_mode = #tpu.pipeline_mode<synchronous>, transform_indices = @transform_3, window_bounds = array<i64: 2, 64, 32>}, {pipeline_mode = #tpu.pipeline_mode<synchronous>, transform_indices = @transform_4, window_bounds = array<i64: 2, 64>}, {pipeline_mode = #tpu.pipeline_mode<synchronous>, transform_indices = @transform_5, window_bounds = array<i64: 8, 32>}, {pipeline_mode = #tpu.pipeline_mode<synchronous>, transform_indices = @transform_6, window_bounds = array<i64: 16, 32>}]} {
    %c0 = arith.constant 0 : index
    %c0_0 = arith.constant 0 : index
    %0 = vector.load %arg1[%c0, %c0_0] : memref<16x32xf32, #tpu.memory_space<vmem>>, vector<16x32xf32>
    %c0_1 = arith.constant 0 : index
    %c0_2 = arith.constant 0 : index
    %1 = vector.load %arg2[%c0_1, %c0_2] : memref<16x32xf32, #tpu.memory_space<vmem>>, vector<16x32xf32>
    %2 = arith.addf %0, %1 : vector<16x32xf32>
    %c0_3 = arith.constant 0 : index
    %c0_4 = arith.constant 0 : index
    %c0_5 = arith.constant 0 : index
    %3 = vector.load %arg3[%c0_3, %c0_4, %c0_5] : memref<2x32x64xf32, #tpu.memory_space<vmem>>, vector<1x32x64xf32>
    %4 = vector.shape_cast %3 : vector<1x32x64xf32> to vector<32x64xf32>
    %c1 = arith.constant 1 : index
    %c0_6 = arith.constant 0 : index
    %c0_7 = arith.constant 0 : index
    %5 = vector.load %arg3[%c1, %c0_6, %c0_7] : memref<2x32x64xf32, #tpu.memory_space<vmem>>, vector<1x32x64xf32>
    %6 = vector.shape_cast %5 : vector<1x32x64xf32> to vector<32x64xf32>
    %c0_8 = arith.constant 0 : index
    %c0_9 = arith.constant 0 : index
    %c0_10 = arith.constant 0 : index
    %7 = vector.load %arg4[%c0_8, %c0_9, %c0_10] : memref<2x64x32xf32, #tpu.memory_space<vmem>>, vector<1x64x32xf32>
    %8 = vector.shape_cast %7 : vector<1x64x32xf32> to vector<64x32xf32>
    %c1_11 = arith.constant 1 : index
    %c0_12 = arith.constant 0 : index
    %c0_13 = arith.constant 0 : index
    %9 = vector.load %arg4[%c1_11, %c0_12, %c0_13] : memref<2x64x32xf32, #tpu.memory_space<vmem>>, vector<1x64x32xf32>
    %10 = vector.shape_cast %9 : vector<1x64x32xf32> to vector<64x32xf32>
    %11 = vector.extract_strided_slice %8 {offsets = [0, 0], sizes = [32, 32], strides = [1, 1]} : vector<64x32xf32> to vector<32x32xf32>
    %12 = vector.extract_strided_slice %8 {offsets = [32, 0], sizes = [32, 32], strides = [1, 1]} : vector<64x32xf32> to vector<32x32xf32>
    %c0_14 = arith.constant 0 : index
    %c0_15 = arith.constant 0 : index
    %13 = vector.load %arg5[%c0_14, %c0_15] : memref<2x64xf32, #tpu.memory_space<vmem>>, vector<2x64xf32>
    %14 = vector.extract_strided_slice %13 {offsets = [0, 0], sizes = [1, 64], strides = [1, 1]} : vector<2x64xf32> to vector<1x64xf32>
    %15 = vector.extract_strided_slice %13 {offsets = [1, 0], sizes = [1, 64], strides = [1, 1]} : vector<2x64xf32> to vector<1x64xf32>
    %c0_16 = arith.constant 0 : index
    %c0_17 = arith.constant 0 : index
    %16 = vector.load %arg6[%c0_16, %c0_17] : memref<8x32xf32, #tpu.memory_space<vmem>>, vector<8x32xf32>
    %17 = vector.extract_strided_slice %16 {offsets = [0, 0], sizes = [1, 32], strides = [1, 1]} : vector<8x32xf32> to vector<1x32xf32>
    %18 = vector.extract_strided_slice %16 {offsets = [1, 0], sizes = [1, 32], strides = [1, 1]} : vector<8x32xf32> to vector<1x32xf32>
    %19 = vector.extract_strided_slice %16 {offsets = [2, 0], sizes = [1, 32], strides = [1, 1]} : vector<8x32xf32> to vector<1x32xf32>
    %20 = vector.extract_strided_slice %16 {offsets = [3, 0], sizes = [1, 32], strides = [1, 1]} : vector<8x32xf32> to vector<1x32xf32>
    %21 = vector.extract_strided_slice %16 {offsets = [4, 0], sizes = [1, 32], strides = [1, 1]} : vector<8x32xf32> to vector<1x32xf32>
    %22 = vector.extract_strided_slice %16 {offsets = [5, 0], sizes = [1, 32], strides = [1, 1]} : vector<8x32xf32> to vector<1x32xf32>
    %23 = vector.extract_strided_slice %16 {offsets = [6, 0], sizes = [1, 32], strides = [1, 1]} : vector<8x32xf32> to vector<1x32xf32>
    %cst = arith.constant dense<0.000000e+00> : vector<16x64xf32>
    %24 = tpu.matmul %2, %4, %cst {dimension_numbers = #tpu.dot_dimension_numbers<[1], [0], [0], [1], [0, 0, 1, 1], [], []>} : vector<16x32xf32>, vector<32x64xf32>, vector<16x64xf32> -> vector<16x64xf32>
    %25 = vector.broadcast %14 : vector<1x64xf32> to vector<16x64xf32>
    %26 = arith.addf %24, %25 : vector<16x64xf32>
    %27 = vector.extract_strided_slice %26 {offsets = [0, 0], sizes = [16, 32], strides = [1, 1]} : vector<16x64xf32> to vector<16x32xf32>
    %28 = vector.extract_strided_slice %26 {offsets = [0, 32], sizes = [16, 32], strides = [1, 1]} : vector<16x64xf32> to vector<16x32xf32>
    %cst_18 = arith.constant dense<0.000000e+00> : vector<16x32xf32>
    %29 = tpu.matmul %0, %11, %cst_18 {dimension_numbers = #tpu.dot_dimension_numbers<[1], [0], [0], [1], [0, 0, 1, 1], [], []>} : vector<16x32xf32>, vector<32x32xf32>, vector<16x32xf32> -> vector<16x32xf32>
    %30 = vector.broadcast %17 : vector<1x32xf32> to vector<16x32xf32>
    %31 = arith.addf %29, %30 : vector<16x32xf32>
    %32 = vector.extract_strided_slice %27 {offsets = [0, 0], sizes = [8, 32], strides = [1, 1]} : vector<16x32xf32> to vector<8x32xf32>
    %33 = vector.extract_strided_slice %28 {offsets = [0, 0], sizes = [8, 32], strides = [1, 1]} : vector<16x32xf32> to vector<8x32xf32>
    %34 = vector.extract_strided_slice %31 {offsets = [0, 0], sizes = [8, 32], strides = [1, 1]} : vector<16x32xf32> to vector<8x32xf32>
    %35 = vector.extract_strided_slice %32 {offsets = [0, 0], sizes = [8, 8], strides = [1, 1]} : vector<8x32xf32> to vector<8x8xf32>
    %36 = vector.extract_strided_slice %33 {offsets = [0, 0], sizes = [8, 8], strides = [1, 1]} : vector<8x32xf32> to vector<8x8xf32>
    %37 = vector.extract_strided_slice %34 {offsets = [0, 0], sizes = [8, 8], strides = [1, 1]} : vector<8x32xf32> to vector<8x8xf32>
    %cst_19 = arith.constant dense<0.000000e+00> : vector<8x8xf32>
    %38 = tpu.matmul %35, %36, %cst_19 {dimension_numbers = #tpu.dot_dimension_numbers<[1], [1], [0], [0], [0, 0, 1, 0], [], []>} : vector<8x8xf32>, vector<8x8xf32>, vector<8x8xf32> -> vector<8x8xf32>
    %cst_20 = arith.constant dense<0xFF800000> : vector<8xf32>
    %39 = vector.multi_reduction <maximumf>, %38, %cst_20 [1] : vector<8x8xf32> to vector<8xf32>
    %40 = vector.shape_cast %39 : vector<8xf32> to vector<8x1xf32>
    %41 = vector.broadcast %40 : vector<8x1xf32> to vector<8x8xf32>
    %42 = arith.subf %38, %41 : vector<8x8xf32>
    %43 = math.exp %42 : vector<8x8xf32>
    %cst_21 = arith.constant dense<0.000000e+00> : vector<8xf32>
    %44 = vector.multi_reduction <add>, %43, %cst_21 [1] : vector<8x8xf32> to vector<8xf32>
    %45 = vector.shape_cast %44 : vector<8xf32> to vector<8x1xf32>
    %46 = tpu.reciprocal %45 {approx = true} : vector<8x1xf32> -> vector<8x1xf32>
    %47 = vector.broadcast %46 : vector<8x1xf32> to vector<8x8xf32>
    %48 = arith.mulf %43, %47 : vector<8x8xf32>
    %cst_22 = arith.constant dense<0.000000e+00> : vector<8x8xf32>
    %49 = tpu.matmul %48, %37, %cst_22 {dimension_numbers = #tpu.dot_dimension_numbers<[1], [0], [0], [1], [0, 0, 1, 1], [], []>} : vector<8x8xf32>, vector<8x8xf32>, vector<8x8xf32> -> vector<8x8xf32>
    %c0_23 = arith.constant 0 : index
    %c0_24 = arith.constant 0 : index
    %50 = vector.load %arg8[%c0_23, %c0_24] : memref<16x32xf32, #tpu.memory_space<vmem>>, vector<8x8xf32>
    tpu.vector_store %arg8[%c0_23, %c0_24], %49 {strides = array<i32>} : memref<16x32xf32, #tpu.memory_space<vmem>>, vector<8x8xf32>,
    %51 = vector.extract_strided_slice %32 {offsets = [0, 8], sizes = [8, 8], strides = [1, 1]} : vector<8x32xf32> to vector<8x8xf32>
    %52 = vector.extract_strided_slice %33 {offsets = [0, 8], sizes = [8, 8], strides = [1, 1]} : vector<8x32xf32> to vector<8x8xf32>
    %53 = vector.extract_strided_slice %34 {offsets = [0, 8], sizes = [8, 8], strides = [1, 1]} : vector<8x32xf32> to vector<8x8xf32>
    %cst_25 = arith.constant dense<0.000000e+00> : vector<8x8xf32>
    %54 = tpu.matmul %51, %52, %cst_25 {dimension_numbers = #tpu.dot_dimension_numbers<[1], [1], [0], [0], [0, 0, 1, 0], [], []>} : vector<8x8xf32>, vector<8x8xf32>, vector<8x8xf32> -> vector<8x8xf32>
    %cst_26 = arith.constant dense<0xFF800000> : vector<8xf32>
    %55 = vector.multi_reduction <maximumf>, %54, %cst_26 [1] : vector<8x8xf32> to vector<8xf32>
    %56 = vector.shape_cast %55 : vector<8xf32> to vector<8x1xf32>
    %57 = vector.broadcast %56 : vector<8x1xf32> to vector<8x8xf32>
    %58 = arith.subf %54, %57 : vector<8x8xf32>
    %59 = math.exp %58 : vector<8x8xf32>
    %cst_27 = arith.constant dense<0.000000e+00> : vector<8xf32>
    %60 = vector.multi_reduction <add>, %59, %cst_27 [1] : vector<8x8xf32> to vector<8xf32>
    %61 = vector.shape_cast %60 : vector<8xf32> to vector<8x1xf32>
    %62 = tpu.reciprocal %61 {approx = true} : vector<8x1xf32> -> vector<8x1xf32>
    %63 = vector.broadcast %62 : vector<8x1xf32> to vector<8x8xf32>
    %64 = arith.mulf %59, %63 : vector<8x8xf32>
    %cst_28 = arith.constant dense<0.000000e+00> : vector<8x8xf32>
    %65 = tpu.matmul %64, %53, %cst_28 {dimension_numbers = #tpu.dot_dimension_numbers<[1], [0], [0], [1], [0, 0, 1, 1], [], []>} : vector<8x8xf32>, vector<8x8xf32>, vector<8x8xf32> -> vector<8x8xf32>
    %c0_29 = arith.constant 0 : index
    %c8 = arith.constant 8 : index
    %66 = vector.load %arg8[%c0_29, %c8] : memref<16x32xf32, #tpu.memory_space<vmem>>, vector<8x8xf32>
    tpu.vector_store %arg8[%c0_29, %c8], %65 {strides = array<i32>} : memref<16x32xf32, #tpu.memory_space<vmem>>, vector<8x8xf32>,
    %67 = vector.extract_strided_slice %32 {offsets = [0, 16], sizes = [8, 8], strides = [1, 1]} : vector<8x32xf32> to vector<8x8xf32>
    %68 = vector.extract_strided_slice %33 {offsets = [0, 16], sizes = [8, 8], strides = [1, 1]} : vector<8x32xf32> to vector<8x8xf32>
    %69 = vector.extract_strided_slice %34 {offsets = [0, 16], sizes = [8, 8], strides = [1, 1]} : vector<8x32xf32> to vector<8x8xf32>
    %cst_30 = arith.constant dense<0.000000e+00> : vector<8x8xf32>
    %70 = tpu.matmul %67, %68, %cst_30 {dimension_numbers = #tpu.dot_dimension_numbers<[1], [1], [0], [0], [0, 0, 1, 0], [], []>} : vector<8x8xf32>, vector<8x8xf32>, vector<8x8xf32> -> vector<8x8xf32>
    %cst_31 = arith.constant dense<0xFF800000> : vector<8xf32>
    %71 = vector.multi_reduction <maximumf>, %70, %cst_31 [1] : vector<8x8xf32> to vector<8xf32>
    %72 = vector.shape_cast %71 : vector<8xf32> to vector<8x1xf32>
    %73 = vector.broadcast %72 : vector<8x1xf32> to vector<8x8xf32>
    %74 = arith.subf %70, %73 : vector<8x8xf32>
    %75 = math.exp %74 : vector<8x8xf32>
    %cst_32 = arith.constant dense<0.000000e+00> : vector<8xf32>
    %76 = vector.multi_reduction <add>, %75, %cst_32 [1] : vector<8x8xf32> to vector<8xf32>
    %77 = vector.shape_cast %76 : vector<8xf32> to vector<8x1xf32>
    %78 = tpu.reciprocal %77 {approx = true} : vector<8x1xf32> -> vector<8x1xf32>
    %79 = vector.broadcast %78 : vector<8x1xf32> to vector<8x8xf32>
    %80 = arith.mulf %75, %79 : vector<8x8xf32>
    %cst_33 = arith.constant dense<0.000000e+00> : vector<8x8xf32>
    %81 = tpu.matmul %80, %69, %cst_33 {dimension_numbers = #tpu.dot_dimension_numbers<[1], [0], [0], [1], [0, 0, 1, 1], [], []>} : vector<8x8xf32>, vector<8x8xf32>, vector<8x8xf32> -> vector<8x8xf32>
    %c0_34 = arith.constant 0 : index
    %c16 = arith.constant 16 : index
    %82 = vector.load %arg8[%c0_34, %c16] : memref<16x32xf32, #tpu.memory_space<vmem>>, vector<8x8xf32>
    tpu.vector_store %arg8[%c0_34, %c16], %81 {strides = array<i32>} : memref<16x32xf32, #tpu.memory_space<vmem>>, vector<8x8xf32>,
    %83 = vector.extract_strided_slice %32 {offsets = [0, 24], sizes = [8, 8], strides = [1, 1]} : vector<8x32xf32> to vector<8x8xf32>
    %84 = vector.extract_strided_slice %33 {offsets = [0, 24], sizes = [8, 8], strides = [1, 1]} : vector<8x32xf32> to vector<8x8xf32>
    %85 = vector.extract_strided_slice %34 {offsets = [0, 24], sizes = [8, 8], strides = [1, 1]} : vector<8x32xf32> to vector<8x8xf32>
    %cst_35 = arith.constant dense<0.000000e+00> : vector<8x8xf32>
    %86 = tpu.matmul %83, %84, %cst_35 {dimension_numbers = #tpu.dot_dimension_numbers<[1], [1], [0], [0], [0, 0, 1, 0], [], []>} : vector<8x8xf32>, vector<8x8xf32>, vector<8x8xf32> -> vector<8x8xf32>
    %cst_36 = arith.constant dense<0xFF800000> : vector<8xf32>
    %87 = vector.multi_reduction <maximumf>, %86, %cst_36 [1] : vector<8x8xf32> to vector<8xf32>
    %88 = vector.shape_cast %87 : vector<8xf32> to vector<8x1xf32>
    %89 = vector.broadcast %88 : vector<8x1xf32> to vector<8x8xf32>
    %90 = arith.subf %86, %89 : vector<8x8xf32>
    %91 = math.exp %90 : vector<8x8xf32>
    %cst_37 = arith.constant dense<0.000000e+00> : vector<8xf32>
    %92 = vector.multi_reduction <add>, %91, %cst_37 [1] : vector<8x8xf32> to vector<8xf32>
    %93 = vector.shape_cast %92 : vector<8xf32> to vector<8x1xf32>
    %94 = tpu.reciprocal %93 {approx = true} : vector<8x1xf32> -> vector<8x1xf32>
    %95 = vector.broadcast %94 : vector<8x1xf32> to vector<8x8xf32>
    %96 = arith.mulf %91, %95 : vector<8x8xf32>
    %cst_38 = arith.constant dense<0.000000e+00> : vector<8x8xf32>
    %97 = tpu.matmul %96, %85, %cst_38 {dimension_numbers = #tpu.dot_dimension_numbers<[1], [0], [0], [1], [0, 0, 1, 1], [], []>} : vector<8x8xf32>, vector<8x8xf32>, vector<8x8xf32> -> vector<8x8xf32>
    %c0_39 = arith.constant 0 : index
    %c24 = arith.constant 24 : index
    %98 = vector.load %arg8[%c0_39, %c24] : memref<16x32xf32, #tpu.memory_space<vmem>>, vector<8x8xf32>
    tpu.vector_store %arg8[%c0_39, %c24], %97 {strides = array<i32>} : memref<16x32xf32, #tpu.memory_space<vmem>>, vector<8x8xf32>,
    %99 = vector.extract_strided_slice %27 {offsets = [8, 0], sizes = [8, 32], strides = [1, 1]} : vector<16x32xf32> to vector<8x32xf32>
    %100 = vector.extract_strided_slice %28 {offsets = [8, 0], sizes = [8, 32], strides = [1, 1]} : vector<16x32xf32> to vector<8x32xf32>
    %101 = vector.extract_strided_slice %31 {offsets = [8, 0], sizes = [8, 32], strides = [1, 1]} : vector<16x32xf32> to vector<8x32xf32>
    %102 = vector.extract_strided_slice %99 {offsets = [0, 0], sizes = [8, 8], strides = [1, 1]} : vector<8x32xf32> to vector<8x8xf32>
    %103 = vector.extract_strided_slice %100 {offsets = [0, 0], sizes = [8, 8], strides = [1, 1]} : vector<8x32xf32> to vector<8x8xf32>
    %104 = vector.extract_strided_slice %101 {offsets = [0, 0], sizes = [8, 8], strides = [1, 1]} : vector<8x32xf32> to vector<8x8xf32>
    %cst_40 = arith.constant dense<0.000000e+00> : vector<8x8xf32>
    %105 = tpu.matmul %102, %103, %cst_40 {dimension_numbers = #tpu.dot_dimension_numbers<[1], [1], [0], [0], [0, 0, 1, 0], [], []>} : vector<8x8xf32>, vector<8x8xf32>, vector<8x8xf32> -> vector<8x8xf32>
    %cst_41 = arith.constant dense<0xFF800000> : vector<8xf32>
    %106 = vector.multi_reduction <maximumf>, %105, %cst_41 [1] : vector<8x8xf32> to vector<8xf32>
    %107 = vector.shape_cast %106 : vector<8xf32> to vector<8x1xf32>
    %108 = vector.broadcast %107 : vector<8x1xf32> to vector<8x8xf32>
    %109 = arith.subf %105, %108 : vector<8x8xf32>
    %110 = math.exp %109 : vector<8x8xf32>
    %cst_42 = arith.constant dense<0.000000e+00> : vector<8xf32>
    %111 = vector.multi_reduction <add>, %110, %cst_42 [1] : vector<8x8xf32> to vector<8xf32>
    %112 = vector.shape_cast %111 : vector<8xf32> to vector<8x1xf32>
    %113 = tpu.reciprocal %112 {approx = true} : vector<8x1xf32> -> vector<8x1xf32>
    %114 = vector.broadcast %113 : vector<8x1xf32> to vector<8x8xf32>
    %115 = arith.mulf %110, %114 : vector<8x8xf32>
    %cst_43 = arith.constant dense<0.000000e+00> : vector<8x8xf32>
    %116 = tpu.matmul %115, %104, %cst_43 {dimension_numbers = #tpu.dot_dimension_numbers<[1], [0], [0], [1], [0, 0, 1, 1], [], []>} : vector<8x8xf32>, vector<8x8xf32>, vector<8x8xf32> -> vector<8x8xf32>
    %c8_44 = arith.constant 8 : index
    %c0_45 = arith.constant 0 : index
    %117 = vector.load %arg8[%c8_44, %c0_45] : memref<16x32xf32, #tpu.memory_space<vmem>>, vector<8x8xf32>
    tpu.vector_store %arg8[%c8_44, %c0_45], %116 {strides = array<i32>} : memref<16x32xf32, #tpu.memory_space<vmem>>, vector<8x8xf32>,
    %118 = vector.extract_strided_slice %99 {offsets = [0, 8], sizes = [8, 8], strides = [1, 1]} : vector<8x32xf32> to vector<8x8xf32>
    %119 = vector.extract_strided_slice %100 {offsets = [0, 8], sizes = [8, 8], strides = [1, 1]} : vector<8x32xf32> to vector<8x8xf32>
    %120 = vector.extract_strided_slice %101 {offsets = [0, 8], sizes = [8, 8], strides = [1, 1]} : vector<8x32xf32> to vector<8x8xf32>
    %cst_46 = arith.constant dense<0.000000e+00> : vector<8x8xf32>
    %121 = tpu.matmul %118, %119, %cst_46 {dimension_numbers = #tpu.dot_dimension_numbers<[1], [1], [0], [0], [0, 0, 1, 0], [], []>} : vector<8x8xf32>, vector<8x8xf32>, vector<8x8xf32> -> vector<8x8xf32>
    %cst_47 = arith.constant dense<0xFF800000> : vector<8xf32>
    %122 = vector.multi_reduction <maximumf>, %121, %cst_47 [1] : vector<8x8xf32> to vector<8xf32>
    %123 = vector.shape_cast %122 : vector<8xf32> to vector<8x1xf32>
    %124 = vector.broadcast %123 : vector<8x1xf32> to vector<8x8xf32>
    %125 = arith.subf %121, %124 : vector<8x8xf32>
    %126 = math.exp %125 : vector<8x8xf32>
    %cst_48 = arith.constant dense<0.000000e+00> : vector<8xf32>
    %127 = vector.multi_reduction <add>, %126, %cst_48 [1] : vector<8x8xf32> to vector<8xf32>
    %128 = vector.shape_cast %127 : vector<8xf32> to vector<8x1xf32>
    %129 = tpu.reciprocal %128 {approx = true} : vector<8x1xf32> -> vector<8x1xf32>
    %130 = vector.broadcast %129 : vector<8x1xf32> to vector<8x8xf32>
    %131 = arith.mulf %126, %130 : vector<8x8xf32>
    %cst_49 = arith.constant dense<0.000000e+00> : vector<8x8xf32>
    %132 = tpu.matmul %131, %120, %cst_49 {dimension_numbers = #tpu.dot_dimension_numbers<[1], [0], [0], [1], [0, 0, 1, 1], [], []>} : vector<8x8xf32>, vector<8x8xf32>, vector<8x8xf32> -> vector<8x8xf32>
    %c8_50 = arith.constant 8 : index
    %c8_51 = arith.constant 8 : index
    %133 = vector.load %arg8[%c8_50, %c8_51] : memref<16x32xf32, #tpu.memory_space<vmem>>, vector<8x8xf32>
    tpu.vector_store %arg8[%c8_50, %c8_51], %132 {strides = array<i32>} : memref<16x32xf32, #tpu.memory_space<vmem>>, vector<8x8xf32>,
    %134 = vector.extract_strided_slice %99 {offsets = [0, 16], sizes = [8, 8], strides = [1, 1]} : vector<8x32xf32> to vector<8x8xf32>
    %135 = vector.extract_strided_slice %100 {offsets = [0, 16], sizes = [8, 8], strides = [1, 1]} : vector<8x32xf32> to vector<8x8xf32>
    %136 = vector.extract_strided_slice %101 {offsets = [0, 16], sizes = [8, 8], strides = [1, 1]} : vector<8x32xf32> to vector<8x8xf32>
    %cst_52 = arith.constant dense<0.000000e+00> : vector<8x8xf32>
    %137 = tpu.matmul %134, %135, %cst_52 {dimension_numbers = #tpu.dot_dimension_numbers<[1], [1], [0], [0], [0, 0, 1, 0], [], []>} : vector<8x8xf32>, vector<8x8xf32>, vector<8x8xf32> -> vector<8x8xf32>
    %cst_53 = arith.constant dense<0xFF800000> : vector<8xf32>
    %138 = vector.multi_reduction <maximumf>, %137, %cst_53 [1] : vector<8x8xf32> to vector<8xf32>
    %139 = vector.shape_cast %138 : vector<8xf32> to vector<8x1xf32>
    %140 = vector.broadcast %139 : vector<8x1xf32> to vector<8x8xf32>
    %141 = arith.subf %137, %140 : vector<8x8xf32>
    %142 = math.exp %141 : vector<8x8xf32>
    %cst_54 = arith.constant dense<0.000000e+00> : vector<8xf32>
    %143 = vector.multi_reduction <add>, %142, %cst_54 [1] : vector<8x8xf32> to vector<8xf32>
    %144 = vector.shape_cast %143 : vector<8xf32> to vector<8x1xf32>
    %145 = tpu.reciprocal %144 {approx = true} : vector<8x1xf32> -> vector<8x1xf32>
    %146 = vector.broadcast %145 : vector<8x1xf32> to vector<8x8xf32>
    %147 = arith.mulf %142, %146 : vector<8x8xf32>
    %cst_55 = arith.constant dense<0.000000e+00> : vector<8x8xf32>
    %148 = tpu.matmul %147, %136, %cst_55 {dimension_numbers = #tpu.dot_dimension_numbers<[1], [0], [0], [1], [0, 0, 1, 1], [], []>} : vector<8x8xf32>, vector<8x8xf32>, vector<8x8xf32> -> vector<8x8xf32>
    %c8_56 = arith.constant 8 : index
    %c16_57 = arith.constant 16 : index
    %149 = vector.load %arg8[%c8_56, %c16_57] : memref<16x32xf32, #tpu.memory_space<vmem>>, vector<8x8xf32>
    tpu.vector_store %arg8[%c8_56, %c16_57], %148 {strides = array<i32>} : memref<16x32xf32, #tpu.memory_space<vmem>>, vector<8x8xf32>,
    %150 = vector.extract_strided_slice %99 {offsets = [0, 24], sizes = [8, 8], strides = [1, 1]} : vector<8x32xf32> to vector<8x8xf32>
    %151 = vector.extract_strided_slice %100 {offsets = [0, 24], sizes = [8, 8], strides = [1, 1]} : vector<8x32xf32> to vector<8x8xf32>
    %152 = vector.extract_strided_slice %101 {offsets = [0, 24], sizes = [8, 8], strides = [1, 1]} : vector<8x32xf32> to vector<8x8xf32>
    %cst_58 = arith.constant dense<0.000000e+00> : vector<8x8xf32>
    %153 = tpu.matmul %150, %151, %cst_58 {dimension_numbers = #tpu.dot_dimension_numbers<[1], [1], [0], [0], [0, 0, 1, 0], [], []>} : vector<8x8xf32>, vector<8x8xf32>, vector<8x8xf32> -> vector<8x8xf32>
    %cst_59 = arith.constant dense<0xFF800000> : vector<8xf32>
    %154 = vector.multi_reduction <maximumf>, %153, %cst_59 [1] : vector<8x8xf32> to vector<8xf32>
    %155 = vector.shape_cast %154 : vector<8xf32> to vector<8x1xf32>
    %156 = vector.broadcast %155 : vector<8x1xf32> to vector<8x8xf32>
    %157 = arith.subf %153, %156 : vector<8x8xf32>
    %158 = math.exp %157 : vector<8x8xf32>
    %cst_60 = arith.constant dense<0.000000e+00> : vector<8xf32>
    %159 = vector.multi_reduction <add>, %158, %cst_60 [1] : vector<8x8xf32> to vector<8xf32>
    %160 = vector.shape_cast %159 : vector<8xf32> to vector<8x1xf32>
    %161 = tpu.reciprocal %160 {approx = true} : vector<8x1xf32> -> vector<8x1xf32>
    %162 = vector.broadcast %161 : vector<8x1xf32> to vector<8x8xf32>
    %163 = arith.mulf %158, %162 : vector<8x8xf32>
    %cst_61 = arith.constant dense<0.000000e+00> : vector<8x8xf32>
    %164 = tpu.matmul %163, %152, %cst_61 {dimension_numbers = #tpu.dot_dimension_numbers<[1], [0], [0], [1], [0, 0, 1, 1], [], []>} : vector<8x8xf32>, vector<8x8xf32>, vector<8x8xf32> -> vector<8x8xf32>
    %c8_62 = arith.constant 8 : index
    %c24_63 = arith.constant 24 : index
    %165 = vector.load %arg8[%c8_62, %c24_63] : memref<16x32xf32, #tpu.memory_space<vmem>>, vector<8x8xf32>
    tpu.vector_store %arg8[%c8_62, %c24_63], %164 {strides = array<i32>} : memref<16x32xf32, #tpu.memory_space<vmem>>, vector<8x8xf32>,
    %c0_64 = arith.constant 0 : index
    %c0_65 = arith.constant 0 : index
    %166 = vector.load %arg8[%c0_64, %c0_65] : memref<16x32xf32, #tpu.memory_space<vmem>>, vector<16x32xf32>
    %cst_66 = arith.constant dense<0.000000e+00> : vector<16x32xf32>
    %167 = tpu.matmul %166, %12, %cst_66 {dimension_numbers = #tpu.dot_dimension_numbers<[1], [0], [0], [1], [0, 0, 1, 1], [], []>} : vector<16x32xf32>, vector<32x32xf32>, vector<16x32xf32> -> vector<16x32xf32>
    %168 = vector.broadcast %18 : vector<1x32xf32> to vector<16x32xf32>
    %169 = arith.addf %167, %168 : vector<16x32xf32>
    %170 = arith.addf %0, %169 : vector<16x32xf32>
    %cst_67 = arith.constant dense<0.000000e+00> : vector<16xf32>
    %171 = vector.multi_reduction <add>, %170, %cst_67 [1] : vector<16x32xf32> to vector<16xf32>
    %172 = vector.shape_cast %171 : vector<16xf32> to vector<16x1xf32>
    %cst_68 = arith.constant 3.200000e+01 : f32
    %173 = vector.broadcast %cst_68 : f32 to vector<16x1xf32>
    %174 = arith.divf %172, %173 : vector<16x1xf32>
    %175 = vector.broadcast %174 : vector<16x1xf32> to vector<16x32xf32>
    %176 = arith.subf %170, %175 : vector<16x32xf32>
    %177 = vector.broadcast %174 : vector<16x1xf32> to vector<16x32xf32>
    %178 = arith.subf %170, %177 : vector<16x32xf32>
    %179 = arith.mulf %176, %178 : vector<16x32xf32>
    %cst_69 = arith.constant dense<0.000000e+00> : vector<16xf32>
    %180 = vector.multi_reduction <add>, %179, %cst_69 [1] : vector<16x32xf32> to vector<16xf32>
    %181 = vector.shape_cast %180 : vector<16xf32> to vector<16x1xf32>
    %cst_70 = arith.constant 3.200000e+01 : f32
    %182 = vector.broadcast %cst_70 : f32 to vector<16x1xf32>
    %183 = arith.divf %181, %182 : vector<16x1xf32>
    %184 = vector.broadcast %174 : vector<16x1xf32> to vector<16x32xf32>
    %185 = arith.subf %170, %184 : vector<16x32xf32>
    %cst_71 = arith.constant 9.99999974E-6 : f32
    %186 = vector.broadcast %cst_71 : f32 to vector<16x1xf32>
    %187 = arith.addf %183, %186 : vector<16x1xf32>
    %188 = math.rsqrt %187 : vector<16x1xf32>
    %189 = vector.broadcast %188 : vector<16x1xf32> to vector<16x32xf32>
    %190 = arith.mulf %185, %189 : vector<16x32xf32>
    %191 = vector.broadcast %20 : vector<1x32xf32> to vector<16x32xf32>
    %192 = arith.mulf %190, %191 : vector<16x32xf32>
    %193 = vector.broadcast %21 : vector<1x32xf32> to vector<16x32xf32>
    %194 = arith.addf %192, %193 : vector<16x32xf32>
    %cst_72 = arith.constant dense<0.000000e+00> : vector<16x64xf32>
    %195 = tpu.matmul %194, %6, %cst_72 {dimension_numbers = #tpu.dot_dimension_numbers<[1], [0], [0], [1], [0, 0, 1, 1], [], []>} : vector<16x32xf32>, vector<32x64xf32>, vector<16x64xf32> -> vector<16x64xf32>
    %196 = vector.broadcast %15 : vector<1x64xf32> to vector<16x64xf32>
    %197 = arith.addf %195, %196 : vector<16x64xf32>
    %cst_73 = arith.constant 0.000000e+00 : f32
    %198 = vector.broadcast %cst_73 : f32 to vector<16x64xf32>
    %199 = arith.maximumf %197, %198 : vector<16x64xf32>
    %cst_74 = arith.constant dense<0.000000e+00> : vector<16x32xf32>
    %200 = tpu.matmul %199, %10, %cst_74 {dimension_numbers = #tpu.dot_dimension_numbers<[1], [0], [0], [1], [0, 0, 1, 1], [], []>} : vector<16x64xf32>, vector<64x32xf32>, vector<16x32xf32> -> vector<16x32xf32>
    %201 = vector.broadcast %19 : vector<1x32xf32> to vector<16x32xf32>
    %202 = arith.addf %200, %201 : vector<16x32xf32>
    %203 = arith.addf %194, %202 : vector<16x32xf32>
    %cst_75 = arith.constant dense<0.000000e+00> : vector<16xf32>
    %204 = vector.multi_reduction <add>, %203, %cst_75 [1] : vector<16x32xf32> to vector<16xf32>
    %205 = vector.shape_cast %204 : vector<16xf32> to vector<16x1xf32>
    %cst_76 = arith.constant 3.200000e+01 : f32
    %206 = vector.broadcast %cst_76 : f32 to vector<16x1xf32>
    %207 = arith.divf %205, %206 : vector<16x1xf32>
    %208 = vector.broadcast %207 : vector<16x1xf32> to vector<16x32xf32>
    %209 = arith.subf %203, %208 : vector<16x32xf32>
    %210 = vector.broadcast %207 : vector<16x1xf32> to vector<16x32xf32>
    %211 = arith.subf %203, %210 : vector<16x32xf32>
    %212 = arith.mulf %209, %211 : vector<16x32xf32>
    %cst_77 = arith.constant dense<0.000000e+00> : vector<16xf32>
    %213 = vector.multi_reduction <add>, %212, %cst_77 [1] : vector<16x32xf32> to vector<16xf32>
    %214 = vector.shape_cast %213 : vector<16xf32> to vector<16x1xf32>
    %cst_78 = arith.constant 3.200000e+01 : f32
    %215 = vector.broadcast %cst_78 : f32 to vector<16x1xf32>
    %216 = arith.divf %214, %215 : vector<16x1xf32>
    %217 = vector.broadcast %207 : vector<16x1xf32> to vector<16x32xf32>
    %218 = arith.subf %203, %217 : vector<16x32xf32>
    %cst_79 = arith.constant 9.99999974E-6 : f32
    %219 = vector.broadcast %cst_79 : f32 to vector<16x1xf32>
    %220 = arith.addf %216, %219 : vector<16x1xf32>
    %221 = math.rsqrt %220 : vector<16x1xf32>
    %222 = vector.broadcast %221 : vector<16x1xf32> to vector<16x32xf32>
    %223 = arith.mulf %218, %222 : vector<16x32xf32>
    %224 = vector.broadcast %22 : vector<1x32xf32> to vector<16x32xf32>
    %225 = arith.mulf %223, %224 : vector<16x32xf32>
    %226 = vector.broadcast %23 : vector<1x32xf32> to vector<16x32xf32>
    %227 = arith.addf %225, %226 : vector<16x32xf32>
    %c0_80 = arith.constant 0 : index
    %c0_81 = arith.constant 0 : index
    %228 = vector.load %arg7[%c0_80, %c0_81] : memref<16x32xf32, #tpu.memory_space<vmem>>, vector<16x32xf32>
    tpu.vector_store %arg7[%c0_80, %c0_81], %227 {strides = array<i32>} : memref<16x32xf32, #tpu.memory_space<vmem>>, vector<16x32xf32>,
    return
  }
  func.func @transform_0(%arg0: i32) -> (i32, i32) {
    %c0_i32 = arith.constant 0 : i32
    %c0_i32_0 = arith.constant 0 : i32
    %c0_i32_1 = arith.constant 0 : i32
    return %c0_i32, %c0_i32_0 : i32, i32
  }
  func.func @transform_1(%arg0: i32) -> (i32, i32) {
    %c0_i32 = arith.constant 0 : i32
    %c0_i32_0 = arith.constant 0 : i32
    %c0_i32_1 = arith.constant 0 : i32
    return %c0_i32, %c0_i32_0 : i32, i32
  }
  func.func @transform_2(%arg0: i32) -> (i32, i32, i32) {
    %c0_i32 = arith.constant 0 : i32
    %c0_i32_0 = arith.constant 0 : i32
    %c0_i32_1 = arith.constant 0 : i32
    %c0_i32_2 = arith.constant 0 : i32
    return %c0_i32, %c0_i32_0, %c0_i32_1 : i32, i32, i32
  }
  func.func @transform_3(%arg0: i32) -> (i32, i32, i32) {
    %c0_i32 = arith.constant 0 : i32
    %c0_i32_0 = arith.constant 0 : i32
    %c0_i32_1 = arith.constant 0 : i32
    %c0_i32_2 = arith.constant 0 : i32
    return %c0_i32, %c0_i32_0, %c0_i32_1 : i32, i32, i32
  }
  func.func @transform_4(%arg0: i32) -> (i32, i32) {
    %c0_i32 = arith.constant 0 : i32
    %c0_i32_0 = arith.constant 0 : i32
    %c0_i32_1 = arith.constant 0 : i32
    return %c0_i32, %c0_i32_0 : i32, i32
  }
  func.func @transform_5(%arg0: i32) -> (i32, i32) {
    %c0_i32 = arith.constant 0 : i32
    %c0_i32_0 = arith.constant 0 : i32
    %c0_i32_1 = arith.constant 0 : i32
    return %c0_i32, %c0_i32_0 : i32, i32
  }
  func.func @transform_6(%arg0: i32) -> (i32, i32) {
    %c0_i32 = arith.constant 0 : i32
    %c0_i32_0 = arith.constant 0 : i32
    %c0_i32_1 = arith.constant 0 : i32
    return %c0_i32, %c0_i32_0 : i32, i32
  }
}

</mosaic_0001>

<bundles_post_ra>
// kernel: transformer_encoder_layer.1
= control target key start
LH: loop header
LB: loop body
LE: loop exit
PB: predicated region body
PF: predicated region fallthrough
CT: control target
= control target key end

     0   :  { %s1298_s0 = inlined_call_operand.vmem [shape: f32[16,32], index: 0, kind: input, shape index: {}]   ;;  %s1299_s1 = inlined_call_operand.vmem [shape: f32[16,32], index: 1, kind: input, shape index: {}]   ;;  %s1300_s2 = inlined_call_operand.vmem [shape: f32[2,32,64], index: 2, kind: input, shape index: {}]   ;;  %s1301_s3 = inlined_call_operand.vmem [shape: f32[2,64,32], index: 3, kind: input, shape index: {}]   ;;  %s1302_s4 = inlined_call_operand.vmem [shape: f32[2,64], index: 4, kind: input, shape index: {}]   ;;  %s1303_s5 = inlined_call_operand.vmem [shape: f32[8,32], index: 5, kind: input, shape index: {}]   ;;  %s1304_s6 = inlined_call_operand.hbm [shape: f32[16,32], index: 6, kind: output, shape index: {}]  }
   0x1   :  { %v33_v0 = vld [vmem:[%s1300_s2 + $0x18] sm:$0xff]  ;;  %v32_v1 = vld [vmem:[%s1300_s2 + $0x10] sm:$0xff]  ;;  %v1079_v2 = vld [vmem:[%s1298_s0] sm:$0xff] }
   0x2   :  { %78 = vmatpush.msra.mxu1 %v33_v0  ;;  %v26_v3 = vld [vmem:[%s1299_s1] sm:$0xff]  ;;  %v31_v4 = vld [vmem:[%s1300_s2 + $0x8] sm:$0xff] }
   0x4   :  { %79 = vmatpush.msra.mxu1 %v32_v1 }
   0x5   :  { %11 = vsyncpa [#allocation4], 0  ;;  %v30_v5 = vld [vmem:[%s1300_s2] sm:$0xff]  ;;  %v28_v6 = vadd.f32 %v26_v3, %v1079_v2  ;;  %vm59_vm0 = vcmask 261120   ;;  %v42_v7 = vld [vmem:[%s1301_s3 + $0x18] sm:$0xff]  ;;  %s1022_s21 = smov 104  }
   0x6   :  { %80 = vmatpush.msra.mxu1 %v31_v4  ;;  %v1098_v8 = vld [vmem:[%s1298_s0 + $0x8] sm:$0xff]  ;;  %v41_v11 = vld [vmem:[%s1301_s3 + $0x10] sm:$0xff]  ;;  %v39_v13 = vld [vmem:[%s1301_s3] sm:$0xff]  ;;  %s1023_s22 = smov 96   ;;  %s1024_s23 = smov 72   ;;  %vm122_vm1 = vcmask 64512  }
   0x7   :  { %v27_v9 = vld [vmem:[%s1299_s1 + $0x8] sm:$0xff]  ;;  %v1121_v14 = vld [vmem:[%s1302_s4] sm:$0x3]  ;;  %s1025_s24 = smov 88   ;;  %s1026_s25 = smov 80   ;;  %vm252_vm2 = vcmask 130112  }
   0x8   :  { %81 = vmatpush.msra.mxu1 %v30_v5  ;;  %v29_v10 = vadd.f32 %v27_v9, %v1098_v8  ;;  %v40_v12 = vld [vmem:[%s1301_s3 + $0x8] sm:$0xff]  ;;  %v58_v15 = vperm.slane %v1121_v14, 0  ;;  %s1027_s4 = smov 112   ;;  %v1132_v19 = vld [vmem:[%s1303_s5] sm:$0xff]  ;;  %s1028_s5 = smov 120   ;;  %vm323_vm3 = vcmask 195712  }
   0x9   :  { %907 = vmatmul.msk.f32.vlgmr.msra.gmra.mxu1 %vm59_vm0, %v28_v6  ;;  %v89_v20 = vperm.slane %v1132_v19, 0  ;;  %s1029_s28 = smov 24   ;;  %s1030_s29 = smov 8   ;;  %vm394_vm4 = vcmask 261312   ;;  %vm793_vm12 = vcmask 523264  }
   0xa   :  { %108 = vmatpush.msrb.mxu1 %v42_v7  ;;  %s1031_s30 = smov 16   ;;  %s883_s14 = sshll.u32 %s1304_s6, 4  ;;  %s884_s14 = int_to_ptr.hbm [resolvable:$true] %s883_s14 }
   0xb   :  { %s1034_s15 = smov 128  }
   0xc   :  { %109 = vmatpush.msrb.mxu1 %v41_v11 }
   0xe   :  { %110 = vmatpush.msrb.mxu1 %v40_v12 }
  0x10   :  { %111 = vmatpush.msrb.mxu1 %v39_v13 }
  0x11   :  { %908 = vmatmul.msk.f32.gmra.mxu1 %vm59_vm0, %v29_v10 }
  0x19   :  { %909 = vmatmul.msk.f32.vlgmr.msrb.gmra.mxu1 %vm59_vm0, %v1079_v2 }
  0x21   :  { %910 = vmatmul.msk.f32.gmra.mxu1 %vm59_vm0, %v1098_v8 }
  0x86   :  { %v83_v16 = vpop.f32.mrf.mxu1 }
  0x87   :  { %v84_v17 = vadd.f32 %v83_v16, %v58_v15 }
  0x89   :  { %325 = vrot.lane.b32.xlu1 %v84_v17, %s1022_s21  ;;  %120 = vrot.lane.b32.xlu0 %v84_v17, %s1023_s22 }
  0x8e   :  { %v86_v18 = vpop.f32.mrf.mxu1 }
  0x8f   :  { %v87_v31 = vadd.f32 %v86_v18, %v58_v15 }
  0x91   :  { %327 = vrot.lane.b32.xlu0 %v84_v17, %s1024_s23 }
  0x96   :  { %v113_v21 = vpop.f32.mrf.mxu1 }
  0x97   :  { %v1137_v22 = vadd.f32 %v113_v21, %v89_v20 }
  0x99   :  { %184 = vrot.lane.b32.xlu0 %v84_v17, %s1025_s24  ;;  %176 = vmatpush.msra.mxu3 %v1137_v22 }
  0x9e   :  { %v116_v11 = vpop.f32.mrf.mxu1 }
  0x9f   :  { %v1184_v12 = vadd.f32 %v116_v11, %v89_v20 }
  0xa1   :  { %256 = vrot.lane.b32.xlu0 %v84_v17, %s1026_s25 }
  0xa9   :  { %254 = vrot.lane.b32.xlu0 %v84_v17, %s1027_s4 }
  0xfb   :  { %v121_v23 = vpop.permute.xlu0 %120  ;;  %v326_v25 = vpop.permute.xlu1 %325 }
  0xfc   :  { %911 = vmatpush.xpose.msk.msra.mxu2 %vm122_vm1, %v121_v23 }
  0xff   :  { %912 = vmatmul.msk.f32.vlgmr.msra.gmra.mxu2 %vm122_vm1, %v84_v17 }
 0x103   :  { %v328_v24 = vpop.permute.xlu0 %327 }
 0x104   :  { %920 = vmatpush.xpose.msk.msra.mxu0 %vm122_vm1, %v328_v24 }
 0x107   :  { %921 = vmatmul.msk.f32.vlgmr.msra.gmra.mxu0 %vm122_vm1, %v326_v25 }
 0x10b   :  { %v185_v26 = vpop.permute.xlu0 %184 }
 0x10c   :  { %914 = vmatpush.xpose.msk.msrb.mxu3 %vm122_vm1, %v185_v26 }
 0x113   :  { %v257_v45 = vpop.permute.xlu0 %256 }
 0x11b   :  { %v255_v47 = vpop.permute.xlu0 %254 }
 0x182   :  { %v144_v27 = vpop.f32.mrf.mxu2 }
 0x183   :  { %v147_v28 = vsel %vm122_vm1, %v144_v27, -inf }
 0x184   :  { %148 = vmax.xlane.f32.xlu1 %v147_v28  ;;  %v350_v29 = vpop.f32.mrf.mxu0 }
 0x185   :  { %v353_v30 = vsel %vm122_vm1, %v350_v29, -inf }
 0x186   :  { %354 = vmax.xlane.f32.xlu2 %v353_v30 }
 0x19d   :  { %531 = vrot.lane.b32.xlu1 %v87_v31, %s1026_s25 }
 0x19e   :  { %182 = vrot.lane.b32.xlu2 %v84_v17, %s1028_s5 }
 0x1a5   :  { %601 = vrot.lane.b32.xlu1 %v87_v31, %s1024_s23 }
 0x1a6   :  { %397 = vrot.lane.b32.xlu2 %v87_v31, %s1023_s22 }
 0x1ae   :  { %364 = vrot.lane.b32.xlu2 %v1137_v22, %s1022_s21 }
 0x1b6   :  { %529 = vrot.lane.b32.xlu2 %v87_v31, %s1027_s4 }
 0x1f7   :  { %v149_v32 = vpop.xlane.xlu1 %148 }
 0x1f8   :  { %v150_v33 = vsub.f32 %v144_v27, %v149_v32 }
 0x1f9   :  { %v355_v34 = vpop.xlane.xlu2 %354 }
 0x1fa   :  { %v151_v35 = vmul.f32 1.442695, %v150_v33  ;;  %v356_v36 = vsub.f32 %v350_v29, %v355_v34 }
 0x1fc   :  { %954 = vpow2.f32 %v151_v35  ;;  %v357_v37 = vmul.f32 1.442695, %v356_v36 }
 0x1fe   :  { %956 = vpow2.f32 %v357_v37 }
 0x201   :  { %v183_v38 = vpop.permute.xlu2 %182 }
 0x202   :  { %v955_v39 = vpop.eup %954 }
 0x203   :  { %v153_v40 = vsel %vm122_vm1, %v955_v39, 0.0 }
 0x204   :  { %v957_v41 = vpop.eup %956  ;;  %154 = vadd.xlane.f32.xlu2 %v153_v40 }
 0x205   :  { %v359_v42 = vsel %vm122_vm1, %v957_v41, 0.0 }
 0x206   :  { %360 = vadd.xlane.f32.xlu0 %v359_v42 }
 0x209   :  { %v398_v43 = vpop.permute.xlu2 %397 }
 0x20f   :  { %v532_v49 = vpop.permute.xlu1 %531 }
 0x211   :  { %v365_v44 = vpop.permute.xlu2 %364 }
 0x212   :  { %385 = vmatpush.msrb.mxu0 %v365_v44 }
 0x217   :  { %v602_v56 = vpop.permute.xlu1 %601 }
 0x219   :  { %v530_v46 = vpop.permute.xlu2 %529 }
 0x21c   :  { %460 = vrot.lane.b32.xlu2 %v87_v31, %s1025_s24 }
 0x224   :  { %458 = vrot.lane.b32.xlu2 %v87_v31, %s1028_s5 }
 0x22c   :  { %599 = vrot.lane.b32.xlu2 %v87_v31, %s1022_s21 }
 0x277   :  { %v155_v48 = vpop.xlane.xlu2 %154 }
 0x278   :  { %958 = vrcp.f32 %v155_v48 }
 0x279   :  { %v361_v50 = vpop.xlane.xlu0 %360 }
 0x27a   :  { %960 = vrcp.f32 %v361_v50 }
 0x27e   :  { %v959_v51 = vpop.eup %958 }
 0x27f   :  { %v461_v52 = vpop.permute.xlu2 %460  ;;  %v157_v53 = vmul.f32 %v959_v51, %v955_v39 }
 0x280   :  { %v961_v54 = vpop.eup %960  ;;  %926 = vmatpush.xpose.msk.msra.mxu0 %vm122_vm1, %v461_v52 }
 0x281   :  { %913 = vmatmul.msk.f32.vlgmr.msra.gmra.mxu3 %vm122_vm1, %v157_v53  ;;  %v363_v55 = vmul.f32 %v961_v54, %v957_v41 }
 0x282   :  { %917 = vmatpush.xpose.msk.msra.mxu3 %vm122_vm1, %v257_v45 }
 0x283   :  { %922 = vmatmul.msk.f32.vlgmr.msrb.gmra.mxu0 %vm122_vm1, %v363_v55 }
 0x284   :  { %932 = vmatpush.xpose.msk.msrb.mxu0 %vm122_vm1, %v602_v56 }
 0x287   :  { %v459_v57 = vpop.permute.xlu2 %458 }
 0x289   :  { %915 = vmatmul.msk.f32.vlgmr.msrb.gmra.mxu3 %vm122_vm1, %v183_v38 }
 0x28a   :  { %923 = vmatpush.xpose.msk.msrb.mxu3 %vm122_vm1, %v398_v43 }
 0x28b   :  { %927 = vmatmul.msk.f32.vlgmr.msra.gmra.mxu0 %vm122_vm1, %v459_v57 }
 0x28f   :  { %v600_v58 = vpop.permute.xlu2 %599 }
 0x291   :  { %918 = vmatmul.msk.f32.vlgmr.msra.gmra.mxu3 %vm122_vm1, %v255_v47 }
 0x292   :  { %929 = vmatpush.xpose.msk.msra.mxu3 %vm122_vm1, %v532_v49 }
 0x293   :  { %933 = vmatmul.msk.f32.vlgmr.msrb.gmra.mxu0 %vm122_vm1, %v600_v58 }
 0x299   :  { %924 = vmatmul.msk.f32.vlgmr.msrb.gmra.mxu3 %vm122_vm1, %v87_v31 }
 0x2a1   :  { %930 = vmatmul.msk.f32.vlgmr.msra.gmra.mxu3 %vm122_vm1, %v530_v46 }
 0x300   :  { %v1172_v60 = vpop.f32.mrf.mxu0 }
 0x304   :  { %v178_v59 = vpop.f32.mrf.mxu3 }
 0x305   :  { %181 = vst.msk [vmem:[#allocation2] sm:$0xff] %vm122_vm1, %v178_v59 }
 0x308   :  { %v483_v63 = vpop.f32.mrf.mxu0 }
 0x309   :  { %v486_v3 = vsel %vm122_vm1, %v483_v63, -inf }
 0x30c   :  { %v207_v61 = vpop.f32.mrf.mxu3 }
 0x30d   :  { %v210_v62 = vsel %vm122_vm1, %v207_v61, -inf }
 0x30e   :  { %211 = vmax.xlane.f32.xlu0 %v210_v62 }
 0x310   :  { %v624_v4 = vpop.f32.mrf.mxu0 }
 0x311   :  { %v627_v7 = vsel %vm122_vm1, %v624_v4, -inf }
 0x314   :  { %v279_v0 = vpop.f32.mrf.mxu3 }
 0x315   :  { %v282_v1 = vsel %vm122_vm1, %v279_v0, -inf }
 0x316   :  { %283 = vmax.xlane.f32.xlu1 %v282_v1  ;;  %487 = vmax.xlane.f32.xlu0 %v486_v3 }
 0x31c   :  { %v420_v5 = vpop.f32.mrf.mxu3 }
 0x31d   :  { %v423_v6 = vsel %vm122_vm1, %v420_v5, -inf }
 0x31e   :  { %424 = vmax.xlane.f32.xlu2 %v423_v6  ;;  %628 = vmax.xlane.f32.xlu0 %v627_v7 }
 0x324   :  { %v554_v9 = vpop.f32.mrf.mxu3 }
 0x325   :  { %v557_v10 = vsel %vm122_vm1, %v554_v9, -inf }
 0x326   :  { %558 = vmax.xlane.f32.xlu0 %v557_v10 }
 0x32f   :  { %222 = vrot.lane.b32.xlu1 %v1137_v22, %s1028_s5 }
 0x337   :  { %498 = vrot.lane.b32.xlu1 %v1184_v12, %s1028_s5 }
 0x33f   :  { %638 = vrot.lane.b32.xlu1 %v1184_v12, %s1022_s21 }
 0x381   :  { %v212_v13 = vpop.xlane.xlu0 %211 }
 0x382   :  { %v213_v15 = vsub.f32 %v207_v61, %v212_v13  ;;  %v45_v13 = vld [vmem:[%s1301_s3 + $0x30] sm:$0xff] }
 0x384   :  { %v214_v16 = vmul.f32 1.442695, %v213_v15  ;;  %v44_v15 = vld [vmem:[%s1301_s3 + $0x28] sm:$0xff] }
 0x386   :  { %962 = vpow2.f32 %v214_v16  ;;  %v43_v16 = vld [vmem:[%s1301_s3 + $0x20] sm:$0xff] }
 0x389   :  { %v284_v17 = vpop.xlane.xlu1 %283  ;;  %v488_v18 = vpop.xlane.xlu0 %487 }
 0x38a   :  { %v285_v21 = vsub.f32 %v279_v0, %v284_v17  ;;  %v489_v23 = vsub.f32 %v483_v63, %v488_v18 }
 0x38c   :  { %v963_v24 = vpop.eup %962  ;;  %v286_v25 = vmul.f32 1.442695, %v285_v21  ;;  %v490_v26 = vmul.f32 1.442695, %v489_v23 }
 0x38d   :  { %v216_v20 = vsel %vm122_vm1, %v963_v24, 0.0 }
 0x38e   :  { %964 = vpow2.f32 %v286_v25  ;;  %217 = vadd.xlane.f32.xlu0 %v216_v20 }
 0x38f   :  { %966 = vpow2.f32 %v490_v26 }
 0x391   :  { %v425_v27 = vpop.xlane.xlu2 %424  ;;  %v629_v28 = vpop.xlane.xlu0 %628 }
 0x392   :  { %v426_v29 = vsub.f32 %v420_v5, %v425_v27  ;;  %v630_v43 = vsub.f32 %v624_v4, %v629_v28  ;;  %v671_v27 = vperm.slane %v1132_v19, 1 }
 0x394   :  { %v965_v30 = vpop.eup %964  ;;  %v427_v31 = vmul.f32 1.442695, %v426_v29  ;;  %v631_v44 = vmul.f32 1.442695, %v630_v43 }
 0x395   :  { %v967_v32 = vpop.eup %966  ;;  %v288_v33 = vsel %vm122_vm1, %v965_v30, 0.0 }
 0x396   :  { %968 = vpow2.f32 %v427_v31  ;;  %289 = vadd.xlane.f32.xlu0 %v288_v33  ;;  %v492_v34 = vsel %vm122_vm1, %v967_v32, 0.0 }
 0x397   :  { %493 = vadd.xlane.f32.xlu2 %v492_v34 }
 0x399   :  { %v559_v35 = vpop.xlane.xlu0 %558 }
 0x39a   :  { %v560_v36 = vsub.f32 %v554_v9, %v559_v35 }
 0x39c   :  { %v969_v37 = vpop.eup %968  ;;  %v561_v38 = vmul.f32 1.442695, %v560_v36  ;;  %v1032_v36 = vmov 32.0  }
 0x39d   :  { %v429_v39 = vsel %vm122_vm1, %v969_v37, 0.0 }
 0x39e   :  { %970 = vpow2.f32 %v561_v38 }
 0x39f   :  { %430 = vadd.xlane.f32.xlu2 %v429_v39  ;;  %972 = vpow2.f32 %v631_v44 }
 0x3a1   :  { %v223_v40 = vpop.permute.xlu1 %222 }
 0x3a2   :  { %243 = vmatpush.msrb.mxu2 %v223_v40 }
 0x3a4   :  { %v971_v41 = vpop.eup %970 }
 0x3a5   :  { %v563_v42 = vsel %vm122_vm1, %v971_v41, 0.0  ;;  %v973_v45 = vpop.eup %972 }
 0x3a6   :  { %v633_v46 = vsel %vm122_vm1, %v973_v45, 0.0 }
 0x3a7   :  { %564 = vadd.xlane.f32.xlu2 %v563_v42 }
 0x3a9   :  { %v499_v47 = vpop.permute.xlu1 %498 }
 0x3aa   :  { %293 = vrot.lane.b32.xlu0 %v1137_v22, %s1027_s4  ;;  %519 = vmatpush.msra.mxu1 %v499_v47 }
 0x3b1   :  { %v639_v51 = vpop.permute.xlu1 %638 }
 0x3b2   :  { %659 = vmatpush.msrb.mxu1 %v639_v51  ;;  %v897_v51 = vld [vmem:[%s1300_s2 + $0x30] sm:$0xff] }
 0x3bf   :  { %568 = vrot.lane.b32.xlu2 %v1184_v12, %s1027_s4 }
 0x3c7   :  { %391 = vrot.lane.b32.xlu2 %v1172_v60, %s1029_s28 }
 0x3d4   :  { %634 = vadd.xlane.f32.xlu0 %v633_v46 }
 0x401   :  { %v218_v48 = vpop.xlane.xlu0 %217 }
 0x402   :  { %974 = vrcp.f32 %v218_v48 }
 0x408   :  { %v975_v49 = vpop.eup %974 }
 0x409   :  { %v220_v22 = vmul.f32 %v975_v49, %v963_v24  ;;  %v290_v52 = vpop.xlane.xlu0 %289 }
 0x40a   :  { %v494_v50 = vpop.xlane.xlu2 %493 }
 0x40b   :  { %976 = vrcp.f32 %v494_v50  ;;  %916 = vmatmul.msk.f32.vlgmr.msrb.gmra.mxu2 %vm122_vm1, %v220_v22  ;;  %v898_v50 = vld [vmem:[%s1300_s2 + $0x38] sm:$0xff] }
 0x40c   :  { %978 = vrcp.f32 %v290_v52  ;;  %v896_v52 = vld [vmem:[%s1300_s2 + $0x28] sm:$0xff] }
 0x411   :  { %v977_v53 = vpop.eup %976 }
 0x412   :  { %v496_v54 = vmul.f32 %v977_v53, %v967_v32  ;;  %v431_v55 = vpop.xlane.xlu2 %430  ;;  %v979_v56 = vpop.eup %978  ;;  %v895_v53 = vld [vmem:[%s1300_s2 + $0x20] sm:$0xff] }
 0x413   :  { %980 = vrcp.f32 %v431_v55  ;;  %v292_v58 = vmul.f32 %v979_v56, %v965_v30 }
 0x414   :  { %928 = vmatmul.msk.f32.vlgmr.msra.gmra.mxu1 %vm122_vm1, %v496_v54 }
 0x419   :  { %v981_v60 = vpop.eup %980 }
 0x41a   :  { %v565_v57 = vpop.xlane.xlu2 %564  ;;  %v433_v62 = vmul.f32 %v981_v60, %v969_v37 }
 0x41b   :  { %982 = vrcp.f32 %v565_v57 }
 0x41c   :  { %v294_v59 = vpop.permute.xlu0 %293 }
 0x41d   :  { %314 = vmatpush.msra.mxu2 %v294_v59 }
 0x41e   :  { %919 = vmatmul.msk.f32.vlgmr.msra.gmra.mxu2 %vm122_vm1, %v292_v58 }
 0x41f   :  { %452 = vmatpush.msrb.mxu2 %v1184_v12  ;;  %v46_v12 = vld [vmem:[%s1301_s3 + $0x38] sm:$0xff] }
 0x420   :  { %690 = vmatpush.msrb.mxu3 %v46_v12  ;;  %v903_v12 = vld [vmem:[%s1301_s3 + $0x60] sm:$0xff] }
 0x421   :  { %v983_v63 = vpop.eup %982 }
 0x422   :  { %v569_v61 = vpop.permute.xlu2 %568  ;;  %v567_v0 = vmul.f32 %v983_v63, %v971_v41  ;;  %691 = vmatpush.msrb.mxu3 %v45_v13  ;;  %v754_v63 = vperm.slane %v1132_v19, 3 }
 0x423   :  { %589 = vmatpush.msra.mxu2 %v569_v61 }
 0x424   :  { %692 = vmatpush.msrb.mxu3 %v44_v15  ;;  %v902_v15 = vld [vmem:[%s1301_s3 + $0x58] sm:$0xff] }
 0x426   :  { %925 = vmatmul.msk.f32.vlgmr.msrb.gmra.mxu2 %vm122_vm1, %v433_v62  ;;  %693 = vmatpush.msrb.mxu3 %v43_v16 }
 0x427   :  { %779 = vmatpush.msrb.mxu2 %v898_v50 }
 0x429   :  { %780 = vmatpush.msrb.mxu2 %v897_v51 }
 0x42a   :  { %v392_v21 = vpop.permute.xlu2 %391 }
 0x42b   :  { %781 = vmatpush.msrb.mxu2 %v896_v52 }
 0x42d   :  { %782 = vmatpush.msrb.mxu2 %v895_v53 }
 0x42e   :  { %931 = vmatmul.msk.f32.vlgmr.msra.gmra.mxu2 %vm122_vm1, %v567_v0 }
 0x447   :  { %v635_v1 = vpop.xlane.xlu0 %634 }
 0x448   :  { %984 = vrcp.f32 %v635_v1 }
 0x449   :  { %986 = vrcp.f32 %v1032_v36 }
 0x44e   :  { %v985_v3 = vpop.eup %984 }
 0x44f   :  { %v637_v4 = vmul.f32 %v985_v3, %v973_v45  ;;  %v987_v37 = vpop.eup %986  ;;  %v757_v3 = vperm.slane %v1132_v19, 4 }
 0x450   :  { %v710_v38 = vmul.f32 32.0, %v987_v37  ;;  %vm714_vm5 = vweird.f32 %v987_v37 }
 0x451   :  { %934 = vmatmul.msk.f32.vlgmr.msrb.gmra.mxu1 %vm122_vm1, %v637_v4 }
 0x452   :  { %v711_v39 = vsub.f32 1.0, %v710_v38  ;;  %v792_v38 = vperm.slane %v1132_v19, 2 }
 0x454   :  { %v712_v40 = vmul.f32 %v987_v37, %v711_v39 }
 0x456   :  { %v713_v41 = vadd.f32 %v987_v37, %v712_v40 }
 0x458   :  { %v1232_v42 = vsel %vm714_vm5, %v987_v37, %v713_v41 }
 0x48e   :  { %v245_v5 = vpop.f32.mrf.mxu2 }
 0x48f   :  { %249 = vrot.lane.b32.xlu1 %v245_v5, %s1030_s29 }
 0x491   :  { %v521_v7 = vpop.f32.mrf.mxu1 }
 0x4a1   :  { %v316_v6 = vpop.f32.mrf.mxu2 }
 0x4a2   :  { %320 = vrot.lane.b32.xlu1 %v316_v6, %s1031_s30  ;;  %v906_v6 = vld [vmem:[%s1301_s3 + $0x78] sm:$0xff] }
 0x4a3   :  { %808 = vmatpush.msra.mxu0 %v906_v6 }
 0x4a9   :  { %v454_v9 = vpop.f32.mrf.mxu2 }
 0x4aa   :  { %457 = vst.msk [vmem:[#allocation2 + $0x8] sm:$0xff] %vm122_vm1, %v454_v9  ;;  %525 = vrot.lane.b32.xlu1 %v521_v7, %s1030_s29  ;;  %v905_v7 = vld [vmem:[%s1301_s3 + $0x70] sm:$0xff]  ;;  %v904_v9 = vld [vmem:[%s1301_s3 + $0x68] sm:$0xff] }
 0x4ab   :  { %809 = vmatpush.msra.mxu0 %v905_v7 }
 0x4ad   :  { %810 = vmatpush.msra.mxu0 %v904_v9 }
 0x4af   :  { %811 = vmatpush.msra.mxu0 %v903_v12 }
 0x4b1   :  { %v591_v10 = vpop.f32.mrf.mxu2  ;;  %812 = vmatpush.msra.mxu0 %v902_v15 }
 0x4b2   :  { %595 = vrot.lane.b32.xlu2 %v591_v10, %s1031_s30 }
 0x4ce   :  { %v661_v11 = vpop.f32.mrf.mxu1 }
 0x4cf   :  { %665 = vrot.lane.b32.xlu1 %v661_v11, %s1029_s28 }
 0x501   :  { %v250_v17 = vpop.permute.xlu1 %249 }
 0x502   :  { %253 = vst.msk [vmem:[#allocation2] sm:$0xff] %vm252_vm2, %v250_v17 }
 0x50c   :  { %v596_v24 = vpop.permute.xlu2 %595 }
 0x514   :  { %v321_v18 = vpop.permute.xlu1 %320 }
 0x515   :  { %324 = vst.msk [vmem:[#allocation2] sm:$0xff] %vm323_vm3, %v321_v18 }
 0x516   :  { %395 = vst.msk [vmem:[#allocation2] sm:$0xff] %vm394_vm4, %v392_v21 }
 0x51c   :  { %v526_v23 = vpop.permute.xlu1 %525 }
 0x51d   :  { %528 = vst.msk [vmem:[#allocation2 + $0x8] sm:$0xff] %vm252_vm2, %v526_v23  ;;  %v669_v25 = vld [vmem:[#allocation2] sm:$0xff] }
 0x51e   :  { %598 = vst.msk [vmem:[#allocation2 + $0x8] sm:$0xff] %vm323_vm3, %v596_v24  ;;  %935 = vmatmul.msk.f32.vlgmr.msrb.gmra.mxu3 %vm59_vm0, %v669_v25 }
 0x541   :  { %v666_v26 = vpop.permute.xlu1 %665 }
 0x542   :  { %668 = vst.msk [vmem:[#allocation2 + $0x8] sm:$0xff] %vm394_vm4, %v666_v26 }
 0x549   :  { %v670_v20 = vld [vmem:[#allocation2 + $0x8] sm:$0xff] }
 0x54a   :  { %936 = vmatmul.msk.f32.gmra.mxu3 %vm59_vm0, %v670_v20 }
 0x5a1   :  { %v695_v28 = vpop.f32.mrf.mxu3 }
 0x5a2   :  { %v696_v29 = vadd.f32 %v695_v28, %v671_v27  ;;  %v901_v28 = vld [vmem:[%s1301_s3 + $0x50] sm:$0xff] }
 0x5a3   :  { %813 = vmatpush.msra.mxu0 %v901_v28 }
 0x5a4   :  { %v701_v30 = vadd.f32 %v696_v29, %v1079_v2  ;;  %v900_v29 = vld [vmem:[%s1301_s3 + $0x48] sm:$0xff] }
 0x5a5   :  { %814 = vmatpush.msra.mxu0 %v900_v29 }
 0x5a6   :  { %v703_v31 = vsel %vm59_vm0, %v701_v30, 0.0 }
 0x5a7   :  { %704 = vadd.xlane.f32.xlu0 %v703_v31  ;;  %v760_v31 = vperm.slane %v1121_v14, 1 }
 0x5cd   :  { %v698_v32 = vpop.f32.mrf.mxu3 }
 0x5ce   :  { %v699_v33 = vadd.f32 %v698_v32, %v671_v27 }
 0x5d0   :  { %v702_v34 = vadd.f32 %v699_v33, %v1098_v8 }
 0x5d2   :  { %v706_v35 = vsel %vm59_vm0, %v702_v34, 0.0 }
 0x5d3   :  { %707 = vadd.xlane.f32.xlu2 %v706_v35 }
 0x61a   :  { %v705_v2 = vpop.xlane.xlu0 %704 }
 0x61b   :  { %v716_v43 = vmul.f32 %v1232_v42, %v705_v2 }
 0x61d   :  { %v718_v44 = vsub.f32 %v701_v30, %v716_v43  ;;  %v899_v30 = vld [vmem:[%s1301_s3 + $0x40] sm:$0xff]  ;;  %s1033_s3 = smov [#allocation3]  }
 0x61e   :  { %815 = vmatpush.msra.mxu0 %v899_v30  ;;  %s881_s11 = sshll.u32 %s1033_s3, 4  ;;  %s882_s11 = int_to_ptr.vmem [resolvable:$true] %s881_s11 }
 0x61f   :  { %v720_v45 = vmul.f32 %v718_v44, %v718_v44 }
 0x621   :  { %v722_v8 = vsel %vm59_vm0, %v720_v45, 0.0 }
 0x622   :  { %723 = vadd.xlane.f32.xlu1 %v722_v8 }
 0x646   :  { %v708_v46 = vpop.xlane.xlu2 %707 }
 0x647   :  { %v717_v47 = vmul.f32 %v1232_v42, %v708_v46 }
 0x649   :  { %v719_v48 = vsub.f32 %v702_v34, %v717_v47 }
 0x64b   :  { %v721_v49 = vmul.f32 %v719_v48, %v719_v48 }
 0x64d   :  { %v725_v22 = vsel %vm59_vm0, %v721_v49, 0.0 }
 0x64e   :  { %726 = vadd.xlane.f32.xlu0 %v725_v22 }
 0x695   :  { %v724_v54 = vpop.xlane.xlu1 %723 }
 0x696   :  { %v728_v55 = vmul.f32 %v724_v54, %v1232_v42 }
 0x698   :  { %v730_v56 = vadd.f32 1e-05, %v728_v55 }
 0x69a   :  { %988 = vrsqrt.f32 %v730_v56  ;;  %vm738_vm7 = vweird.f32 %v730_v56 }
 0x6a0   :  { %v989_v57 = vpop.eup %988 }
 0x6a1   :  { %v733_v58 = vmul.f32 %v989_v57, %v730_v56  ;;  %vm739_vm6 = vweird.f32 %v989_v57 }
 0x6a2   :  { %vm740_vm8 = vmor %vm738_vm7, %vm739_vm6 }
 0x6a3   :  { %v734_v59 = vmul.f32 %v989_v57, %v733_v58 }
 0x6a5   :  { %v735_v60 = vmul.f32 0.5, %v734_v59 }
 0x6a7   :  { %v736_v61 = vsub.f32 1.5, %v735_v60 }
 0x6a9   :  { %v737_v62 = vmul.f32 %v989_v57, %v736_v61 }
 0x6ab   :  { %v741_v0 = vsel %vm740_vm8, %v989_v57, %v737_v62 }
 0x6ac   :  { %v752_v1 = vmul.f32 %v741_v0, %v718_v44 }
 0x6ae   :  { %v755_v4 = vmul.f32 %v754_v63, %v752_v1 }
 0x6b0   :  { %v758_v5 = vadd.f32 %v757_v3, %v755_v4 }
 0x6b2   :  { %937 = vmatmul.msk.f32.vlgmr.msrb.gmra.mxu2 %vm59_vm0, %v758_v5 }
 0x6c1   :  { %v727_v10 = vpop.xlane.xlu0 %726 }
 0x6c2   :  { %v729_v11 = vmul.f32 %v727_v10, %v1232_v42 }
 0x6c4   :  { %v731_v13 = vadd.f32 1e-05, %v729_v11 }
 0x6c6   :  { %990 = vrsqrt.f32 %v731_v13  ;;  %vm748_vm10 = vweird.f32 %v731_v13 }
 0x6cc   :  { %v991_v16 = vpop.eup %990 }
 0x6cd   :  { %v743_v17 = vmul.f32 %v991_v16, %v731_v13  ;;  %vm749_vm9 = vweird.f32 %v991_v16 }
 0x6ce   :  { %vm750_vm11 = vmor %vm748_vm10, %vm749_vm9 }
 0x6cf   :  { %v744_v18 = vmul.f32 %v991_v16, %v743_v17 }
 0x6d1   :  { %v745_v21 = vmul.f32 0.5, %v744_v18 }
 0x6d3   :  { %v746_v23 = vsub.f32 1.5, %v745_v21 }
 0x6d5   :  { %v747_v24 = vmul.f32 %v991_v16, %v746_v23 }
 0x6d7   :  { %v751_v25 = vsel %vm750_vm11, %v991_v16, %v747_v24 }
 0x6d8   :  { %v753_v26 = vmul.f32 %v751_v25, %v719_v48 }
 0x6da   :  { %v756_v20 = vmul.f32 %v754_v63, %v753_v26  ;;  %v869_v63 = vperm.slane %v1132_v19, 5 }
 0x6dc   :  { %v759_v27 = vadd.f32 %v757_v3, %v756_v20  ;;  %v872_v3 = vperm.slane %v1132_v19, 6 }
 0x6de   :  { %938 = vmatmul.msk.f32.gmra.mxu2 %vm59_vm0, %v759_v27 }
 0x735   :  { %v784_v32 = vpop.f32.mrf.mxu2 }
 0x736   :  { %v785_v33 = vadd.f32 %v784_v32, %v760_v31 }
 0x738   :  { %v790_v34 = vmax.f32 %v785_v33, 0.0 }
 0x73a   :  { %939 = vmatmul.msk.f32.vlgmr.msra.gmra.mxu0 %vm793_vm12, %v790_v34 }
 0x761   :  { %v787_v35 = vpop.f32.mrf.mxu2 }
 0x762   :  { %v788_v36 = vadd.f32 %v787_v35, %v760_v31 }
 0x764   :  { %v791_v37 = vmax.f32 %v788_v36, 0.0 }
 0x766   :  { %940 = vmatmul.msk.f32.gmra.mxu0 %vm793_vm12, %v791_v37 }
 0x7b7   :  { %v817_v39 = vpop.f32.mrf.mxu0 }
 0x7b8   :  { %v818_v40 = vadd.f32 %v817_v39, %v792_v38 }
 0x7ba   :  { %v823_v41 = vadd.f32 %v818_v40, %v758_v5 }
 0x7bc   :  { %v825_v2 = vsel %vm59_vm0, %v823_v41, 0.0 }
 0x7bd   :  { %826 = vadd.xlane.f32.xlu0 %v825_v2 }
 0x7e3   :  { %v820_v43 = vpop.f32.mrf.mxu0 }
 0x7e4   :  { %v821_v44 = vadd.f32 %v820_v43, %v792_v38 }
 0x7e6   :  { %v824_v14 = vadd.f32 %v821_v44, %v759_v27 }
 0x7e8   :  { %v828_v45 = vsel %vm59_vm0, %v824_v14, 0.0 }
 0x7e9   :  { %829 = vadd.xlane.f32.xlu0 %v828_v45 }
 0x830   :  { %v827_v8 = vpop.xlane.xlu0 %826 }
 0x831   :  { %v831_v46 = vmul.f32 %v827_v8, %v1232_v42 }
 0x833   :  { %v833_v47 = vsub.f32 %v823_v41, %v831_v46 }
 0x835   :  { %v835_v48 = vmul.f32 %v833_v47, %v833_v47 }
 0x837   :  { %v837_v49 = vsel %vm59_vm0, %v835_v48, 0.0 }
 0x838   :  { %838 = vadd.xlane.f32.xlu0 %v837_v49 }
 0x85c   :  { %v830_v22 = vpop.xlane.xlu0 %829 }
 0x85d   :  { %v832_v50 = vmul.f32 %v830_v22, %v1232_v42 }
 0x85f   :  { %v834_v51 = vsub.f32 %v824_v14, %v832_v50 }
 0x861   :  { %v836_v52 = vmul.f32 %v834_v51, %v834_v51 }
 0x863   :  { %v840_v53 = vsel %vm59_vm0, %v836_v52, 0.0 }
 0x864   :  { %841 = vadd.xlane.f32.xlu0 %v840_v53 }
 0x8ab   :  { %v839_v54 = vpop.xlane.xlu0 %838 }
 0x8ac   :  { %v843_v55 = vmul.f32 %v839_v54, %v1232_v42 }
 0x8ae   :  { %v845_v56 = vadd.f32 1e-05, %v843_v55 }
 0x8b0   :  { %992 = vrsqrt.f32 %v845_v56  ;;  %vm853_vm14 = vweird.f32 %v845_v56 }
 0x8b6   :  { %v993_v57 = vpop.eup %992 }
 0x8b7   :  { %v848_v58 = vmul.f32 %v993_v57, %v845_v56  ;;  %vm854_vm13 = vweird.f32 %v993_v57 }
 0x8b8   :  { %vm855_vm15 = vmor %vm853_vm14, %vm854_vm13 }
 0x8b9   :  { %v849_v59 = vmul.f32 %v993_v57, %v848_v58 }
 0x8bb   :  { %v850_v60 = vmul.f32 0.5, %v849_v59 }
 0x8bd   :  { %v851_v61 = vsub.f32 1.5, %v850_v60 }
 0x8bf   :  { %v852_v62 = vmul.f32 %v993_v57, %v851_v61 }
 0x8c1   :  { %v856_v0 = vsel %vm855_vm15, %v993_v57, %v852_v62 }
 0x8c2   :  { %v867_v1 = vmul.f32 %v856_v0, %v833_v47 }
 0x8c4   :  { %v870_v4 = vmul.f32 %v869_v63, %v867_v1 }
 0x8c6   :  { %v873_v5 = vadd.f32 %v872_v3, %v870_v4 }
 0x8c8   :  { %875 = vst.msk [vmem:[#allocation3] sm:$0xff] %vm59_vm0, %v873_v5 }
 0x8d7   :  { %v842_v6 = vpop.xlane.xlu0 %841 }
 0x8d8   :  { %v844_v7 = vmul.f32 %v842_v6, %v1232_v42 }
 0x8da   :  { %v846_v9 = vadd.f32 1e-05, %v844_v7 }
 0x8dc   :  { %994 = vrsqrt.f32 %v846_v9  ;;  %vm863_vm2 = vweird.f32 %v846_v9 }
 0x8e2   :  { %v995_v10 = vpop.eup %994 }
 0x8e3   :  { %v858_v11 = vmul.f32 %v995_v10, %v846_v9  ;;  %vm864_vm1 = vweird.f32 %v995_v10 }
 0x8e4   :  { %vm865_vm3 = vmor %vm863_vm2, %vm864_vm1 }
 0x8e5   :  { %v859_v12 = vmul.f32 %v995_v10, %v858_v11 }
 0x8e7   :  { %v860_v13 = vmul.f32 0.5, %v859_v12 }
 0x8e9   :  { %v861_v15 = vsub.f32 1.5, %v860_v13 }
 0x8eb   :  { %v862_v16 = vmul.f32 %v995_v10, %v861_v15 }
 0x8ed   :  { %v866_v17 = vsel %vm865_vm3, %v995_v10, %v862_v16 }
 0x8ee   :  { %v868_v19 = vmul.f32 %v866_v17, %v834_v51 }
 0x8f0   :  { %v871_v42 = vmul.f32 %v869_v63, %v868_v19 }
 0x8f2   :  { %v874_v18 = vadd.f32 %v872_v3, %v871_v42 }
 0x8f4   :  { %876 = vst.msk [vmem:[#allocation3 + $0x8] sm:$0xff] %vm59_vm0, %v874_v18 }
 0x8f5   :  { %889 = dma.vmem_to_hbm [thread:$0]  %s882_s11, 256, %s884_s14, [#allocation4], %s1034_s15, %s1034_s15, %s1030_s29  }
 0x8f6   :  { %1020 = dma.done.wait [#allocation4], 256  }
 0x8f7   :  { %1021 = vsyncadd [#allocation4], 4294967040 }
 0x8f8   :  { %894 = vsyncpa [#allocation4], 1 }

</bundles_post_ra>
